<compile_context>
chip_gen: v7x
topology: tpu7x:2x2x1
jax: 0.10.0
libtpu: 0.0.40
codegen_flags: <defaults>
</compile_context>

<pallas_src>
import jax
import jax.numpy as jnp
from jax.experimental import pallas as pl
from jax.experimental.pallas import tpu as pltpu


def crf_nll_kernel(logits_ref, labels_ref, trans_ref, out_ref):
    """Single invocation: computes the batch-summed CRF NLL."""
    logits = logits_ref[...].astype(jnp.float32)   # (B, T, K)
    labels = labels_ref[...].astype(jnp.float32)   # (B, T, K)  one-hot gold tags
    trans = trans_ref[...].astype(jnp.float32)     # (K, K)
    B, T, K = logits.shape

    # ---- numerator: score of the gold path -------------------------------
    emit_score = jnp.sum(logits * labels)

    # Gold transition score, hoisted out of the recursion:
    # one (B*T, K) @ (K, K) matmul, then shifted elementwise product + full reduce.
    lab_flat = labels.reshape(B * T, K)
    lab_trans = jnp.dot(lab_flat, trans,
                        preferred_element_type=jnp.float32).reshape(B, T, K)
    trans_score = jnp.sum(lab_trans[:, : T - 1, :] * labels[:, 1:, :])

    # ---- denominator: batched forward algorithm (log partition) ----------
    # logsumexp_i(alpha[b,i] + trans[i,j]) as a max-shifted (B,K)x(K,K) matmul so
    # the recursion stays in clean 2-D shapes; exp_trans / m_t computed once.
    # NOTE(v5e): for tiny K the matmul gives no MXU benefit, but correctness and
    # lowering are simplest this way; the batched form amortizes the per-step cost.
    m_t = jnp.max(trans, axis=0, keepdims=True)    # (1, K) column-wise max
    exp_trans = jnp.exp(trans - m_t)               # (K, K)

    alpha = logits[:, 0, :]                        # (B, K)
    for t in range(1, T):                          # T is small & static -> unrolled
        m_a = jnp.max(alpha, axis=-1, keepdims=True)                      # (B, 1)
        s = jnp.dot(jnp.exp(alpha - m_a), exp_trans,
                    preferred_element_type=jnp.float32)                   # (B, K)
        alpha = m_a + m_t + jnp.log(s) + logits[:, t, :]                  # (B, K)

    m_f = jnp.max(alpha, axis=-1, keepdims=True)                          # (B, 1)
    log_z = m_f + jnp.log(jnp.sum(jnp.exp(alpha - m_f),
                                  axis=-1, keepdims=True))                # (B, 1)

    nll = jnp.sum(log_z) - (emit_score + trans_score)
    out_ref[...] = nll + jnp.zeros_like(out_ref)


@jax.jit
def j_crf_forward(inputs, labels_onehot, transitions):
    """inputs: (B, T, K) float32, labels_onehot: (B, T, K), transitions: (K, K)."""
    B, T, K = inputs.shape
    out = pl.pallas_call(
        crf_nll_kernel,
        out_shape=jax.ShapeDtypeStruct((1, 1), jnp.float32),
        grid_spec=pltpu.PrefetchScalarGridSpec(
            num_scalar_prefetch=0,
            grid=(1,),                                           # whole batch in one step
            in_specs=[
                pl.BlockSpec((B, T, K), lambda i: (0, 0, 0)),    # emissions
                pl.BlockSpec((B, T, K), lambda i: (0, 0, 0)),    # one-hot labels
                pl.BlockSpec((K, K), lambda i: (0, 0)),          # transition matrix
            ],
            out_specs=pl.BlockSpec((1, 1), lambda i: (0, 0)),
        ),
        compiler_params=pltpu.CompilerParams(
            dimension_semantics=("arbitrary",)),
    )(inputs, labels_onehot, transitions)
    return out[0, 0]
    # TODO(synk): for large B, tile the batch on a "parallel" grid axis with
    # lane-dense per-sequence NLL outputs and sum in the wrapper (v7x megacore);
    # for large T switch the static time loop to lax.fori_loop(..., unroll=True).


def j_crf_reference(inputs, labels_onehot, transitions):
    """Pure-JAX reference (same math, no Pallas)."""
    B, T, K = inputs.shape
    emit = jnp.sum(inputs * labels_onehot)
    trans_sc = jnp.einsum('bti,ij,btj->', labels_onehot[:, :-1], transitions,
                          labels_onehot[:, 1:])
    alpha = inputs[:, 0, :]
    for t in range(1, T):
        alpha = jax.nn.logsumexp(alpha[:, :, None] + transitions[None, :, :],
                                 axis=1) + inputs[:, t, :]
    log_z = jax.nn.logsumexp(alpha, axis=-1)
    return jnp.sum(log_z) - (emit + trans_sc)


if __name__ == "__main__":
    # num_tags = len(label_dic) = 3  ('O', 'B-a', 'I-a')
    B, T, K = 2, 8, 3

    key = jax.random.PRNGKey(0)
    k_in, k_lab, k_tr = jax.random.split(key, 3)

    # emissions (logits) -- analogue of `inputs` in the reference script
    inputs = jax.random.normal(k_in, (B, T, K), dtype=jnp.float32)

    # gold tag ids, one-hot encoded -- analogue of `labels = onehot(LABELS, 3)`
    tag_ids = jax.random.randint(k_lab, (B, T), 0, K)
    labels_onehot = jax.nn.one_hot(tag_ids, K, dtype=jnp.float32)

    # CRF transition parameters (deterministic init; xavier-ish scale)
    transitions = 0.1 * jax.random.normal(k_tr, (K, K), dtype=jnp.float32)

    nll = j_crf_forward(inputs, labels_onehot, transitions)
    nll = jax.block_until_ready(nll)

    ref = j_crf_reference(inputs, labels_onehot, transitions)
    assert jnp.allclose(nll, ref, rtol=1e-4, atol=1e-4), (nll, ref)

    print("KERNEL_OK")
</pallas_src>

<mosaic_0001>
module attributes {stable_mosaic.version = 11 : i64} {
  func.func @crf_nll_kernel(%arg0: i32, %arg1: memref<2x8x3xf32, #tpu.memory_space<vmem>>, %arg2: memref<2x8x3xf32, #tpu.memory_space<vmem>>, %arg3: memref<3x3xf32, #tpu.memory_space<vmem>>, %arg4: memref<1x1xf32, #tpu.memory_space<vmem>>) attributes {dimension_semantics = [#tpu.dimension_semantics<arbitrary>], iteration_bounds = array<i64: 1>, scalar_prefetch = 0 : i64, scratch_operands = 0 : i64, tpu.core_type = #tpu.core_type<tc>, window_params = [{pipeline_mode = #tpu.pipeline_mode<synchronous>, transform_indices = @transform_0, window_bounds = array<i64: 2, 8, 3>}, {pipeline_mode = #tpu.pipeline_mode<synchronous>, transform_indices = @transform_1, window_bounds = array<i64: 2, 8, 3>}, {pipeline_mode = #tpu.pipeline_mode<synchronous>, transform_indices = @transform_2, window_bounds = array<i64: 3, 3>}, {pipeline_mode = #tpu.pipeline_mode<synchronous>, transform_indices = @transform_3, window_bounds = array<i64: 1, 1>}]} {
    %c0 = arith.constant 0 : index
    %c0_0 = arith.constant 0 : index
    %c0_1 = arith.constant 0 : index
    %0 = vector.load %arg1[%c0, %c0_0, %c0_1] : memref<2x8x3xf32, #tpu.memory_space<vmem>>, vector<2x8x3xf32>
    %c0_2 = arith.constant 0 : index
    %c0_3 = arith.constant 0 : index
    %c0_4 = arith.constant 0 : index
    %1 = vector.load %arg2[%c0_2, %c0_3, %c0_4] : memref<2x8x3xf32, #tpu.memory_space<vmem>>, vector<2x8x3xf32>
    %c0_5 = arith.constant 0 : index
    %c0_6 = arith.constant 0 : index
    %2 = vector.load %arg3[%c0_5, %c0_6] : memref<3x3xf32, #tpu.memory_space<vmem>>, vector<3x3xf32>
    %3 = arith.mulf %0, %1 : vector<2x8x3xf32>
    %4 = vector.shape_cast %3 : vector<2x8x3xf32> to vector<1x2x8x3xf32>
    %cst = arith.constant dense<0.000000e+00> : vector<1xf32>
    %5 = vector.multi_reduction <add>, %4, %cst [1, 2, 3] : vector<1x2x8x3xf32> to vector<1xf32>
    %6 = vector.shape_cast %5 : vector<1xf32> to vector<1x1x1x1xf32>
    %7 = vector.extract %6[0, 0, 0, 0] : f32 from vector<1x1x1x1xf32>
    %8 = vector.shape_cast %1 : vector<2x8x3xf32> to vector<16x3xf32>
    %cst_7 = arith.constant dense<0.000000e+00> : vector<16x3xf32>
    %9 = tpu.matmul %8, %2, %cst_7 {dimension_numbers = #tpu.dot_dimension_numbers<[1], [0], [0], [1], [0, 0, 1, 1], [], []>} : vector<16x3xf32>, vector<3x3xf32>, vector<16x3xf32> -> vector<16x3xf32>
    %10 = vector.shape_cast %9 : vector<16x3xf32> to vector<2x8x3xf32>
    %11 = vector.extract_strided_slice %10 {offsets = [0, 0, 0], sizes = [2, 7, 3], strides = [1, 1, 1]} : vector<2x8x3xf32> to vector<2x7x3xf32>
    %12 = vector.extract_strided_slice %1 {offsets = [0, 1, 0], sizes = [2, 7, 3], strides = [1, 1, 1]} : vector<2x8x3xf32> to vector<2x7x3xf32>
    %13 = arith.mulf %11, %12 : vector<2x7x3xf32>
    %14 = vector.shape_cast %13 : vector<2x7x3xf32> to vector<1x2x7x3xf32>
    %cst_8 = arith.constant dense<0.000000e+00> : vector<1xf32>
    %15 = vector.multi_reduction <add>, %14, %cst_8 [1, 2, 3] : vector<1x2x7x3xf32> to vector<1xf32>
    %16 = vector.shape_cast %15 : vector<1xf32> to vector<1x1x1x1xf32>
    %17 = vector.extract %16[0, 0, 0, 0] : f32 from vector<1x1x1x1xf32>
    %cst_9 = arith.constant dense<0xFF800000> : vector<3xf32>
    %18 = vector.multi_reduction <maximumf>, %2, %cst_9 [0] : vector<3x3xf32> to vector<3xf32>
    %19 = vector.shape_cast %18 : vector<3xf32> to vector<1x3xf32>
    %20 = vector.broadcast %19 : vector<1x3xf32> to vector<3x3xf32>
    %21 = arith.subf %2, %20 : vector<3x3xf32>
    %22 = math.exp %21 : vector<3x3xf32>
    %23 = vector.extract_strided_slice %0 {offsets = [0, 0, 0], sizes = [2, 1, 3], strides = [1, 1, 1]} : vector<2x8x3xf32> to vector<2x1x3xf32>
    %24 = vector.shape_cast %23 : vector<2x1x3xf32> to vector<2x3xf32>
    %cst_10 = arith.constant dense<0xFF800000> : vector<2xf32>
    %25 = vector.multi_reduction <maximumf>, %24, %cst_10 [1] : vector<2x3xf32> to vector<2xf32>
    %26 = vector.shape_cast %25 : vector<2xf32> to vector<2x1xf32>
    %27 = vector.broadcast %26 : vector<2x1xf32> to vector<2x3xf32>
    %28 = arith.subf %24, %27 : vector<2x3xf32>
    %29 = math.exp %28 : vector<2x3xf32>
    %cst_11 = arith.constant dense<0.000000e+00> : vector<2x3xf32>
    %30 = tpu.matmul %29, %22, %cst_11 {dimension_numbers = #tpu.dot_dimension_numbers<[1], [0], [0], [1], [0, 0, 1, 1], [], []>} : vector<2x3xf32>, vector<3x3xf32>, vector<2x3xf32> -> vector<2x3xf32>
    %31 = vector.broadcast %26 : vector<2x1xf32> to vector<2x3xf32>
    %32 = vector.broadcast %19 : vector<1x3xf32> to vector<2x3xf32>
    %33 = arith.addf %31, %32 : vector<2x3xf32>
    %34 = math.log %30 : vector<2x3xf32>
    %35 = arith.addf %33, %34 : vector<2x3xf32>
    %36 = vector.extract_strided_slice %0 {offsets = [0, 1, 0], sizes = [2, 1, 3], strides = [1, 1, 1]} : vector<2x8x3xf32> to vector<2x1x3xf32>
    %37 = vector.shape_cast %36 : vector<2x1x3xf32> to vector<2x3xf32>
    %38 = arith.addf %35, %37 : vector<2x3xf32>
    %cst_12 = arith.constant dense<0xFF800000> : vector<2xf32>
    %39 = vector.multi_reduction <maximumf>, %38, %cst_12 [1] : vector<2x3xf32> to vector<2xf32>
    %40 = vector.shape_cast %39 : vector<2xf32> to vector<2x1xf32>
    %41 = vector.broadcast %40 : vector<2x1xf32> to vector<2x3xf32>
    %42 = arith.subf %38, %41 : vector<2x3xf32>
    %43 = math.exp %42 : vector<2x3xf32>
    %cst_13 = arith.constant dense<0.000000e+00> : vector<2x3xf32>
    %44 = tpu.matmul %43, %22, %cst_13 {dimension_numbers = #tpu.dot_dimension_numbers<[1], [0], [0], [1], [0, 0, 1, 1], [], []>} : vector<2x3xf32>, vector<3x3xf32>, vector<2x3xf32> -> vector<2x3xf32>
    %45 = vector.broadcast %40 : vector<2x1xf32> to vector<2x3xf32>
    %46 = vector.broadcast %19 : vector<1x3xf32> to vector<2x3xf32>
    %47 = arith.addf %45, %46 : vector<2x3xf32>
    %48 = math.log %44 : vector<2x3xf32>
    %49 = arith.addf %47, %48 : vector<2x3xf32>
    %50 = vector.extract_strided_slice %0 {offsets = [0, 2, 0], sizes = [2, 1, 3], strides = [1, 1, 1]} : vector<2x8x3xf32> to vector<2x1x3xf32>
    %51 = vector.shape_cast %50 : vector<2x1x3xf32> to vector<2x3xf32>
    %52 = arith.addf %49, %51 : vector<2x3xf32>
    %cst_14 = arith.constant dense<0xFF800000> : vector<2xf32>
    %53 = vector.multi_reduction <maximumf>, %52, %cst_14 [1] : vector<2x3xf32> to vector<2xf32>
    %54 = vector.shape_cast %53 : vector<2xf32> to vector<2x1xf32>
    %55 = vector.broadcast %54 : vector<2x1xf32> to vector<2x3xf32>
    %56 = arith.subf %52, %55 : vector<2x3xf32>
    %57 = math.exp %56 : vector<2x3xf32>
    %cst_15 = arith.constant dense<0.000000e+00> : vector<2x3xf32>
    %58 = tpu.matmul %57, %22, %cst_15 {dimension_numbers = #tpu.dot_dimension_numbers<[1], [0], [0], [1], [0, 0, 1, 1], [], []>} : vector<2x3xf32>, vector<3x3xf32>, vector<2x3xf32> -> vector<2x3xf32>
    %59 = vector.broadcast %54 : vector<2x1xf32> to vector<2x3xf32>
    %60 = vector.broadcast %19 : vector<1x3xf32> to vector<2x3xf32>
    %61 = arith.addf %59, %60 : vector<2x3xf32>
    %62 = math.log %58 : vector<2x3xf32>
    %63 = arith.addf %61, %62 : vector<2x3xf32>
    %64 = vector.extract_strided_slice %0 {offsets = [0, 3, 0], sizes = [2, 1, 3], strides = [1, 1, 1]} : vector<2x8x3xf32> to vector<2x1x3xf32>
    %65 = vector.shape_cast %64 : vector<2x1x3xf32> to vector<2x3xf32>
    %66 = arith.addf %63, %65 : vector<2x3xf32>
    %cst_16 = arith.constant dense<0xFF800000> : vector<2xf32>
    %67 = vector.multi_reduction <maximumf>, %66, %cst_16 [1] : vector<2x3xf32> to vector<2xf32>
    %68 = vector.shape_cast %67 : vector<2xf32> to vector<2x1xf32>
    %69 = vector.broadcast %68 : vector<2x1xf32> to vector<2x3xf32>
    %70 = arith.subf %66, %69 : vector<2x3xf32>
    %71 = math.exp %70 : vector<2x3xf32>
    %cst_17 = arith.constant dense<0.000000e+00> : vector<2x3xf32>
    %72 = tpu.matmul %71, %22, %cst_17 {dimension_numbers = #tpu.dot_dimension_numbers<[1], [0], [0], [1], [0, 0, 1, 1], [], []>} : vector<2x3xf32>, vector<3x3xf32>, vector<2x3xf32> -> vector<2x3xf32>
    %73 = vector.broadcast %68 : vector<2x1xf32> to vector<2x3xf32>
    %74 = vector.broadcast %19 : vector<1x3xf32> to vector<2x3xf32>
    %75 = arith.addf %73, %74 : vector<2x3xf32>
    %76 = math.log %72 : vector<2x3xf32>
    %77 = arith.addf %75, %76 : vector<2x3xf32>
    %78 = vector.extract_strided_slice %0 {offsets = [0, 4, 0], sizes = [2, 1, 3], strides = [1, 1, 1]} : vector<2x8x3xf32> to vector<2x1x3xf32>
    %79 = vector.shape_cast %78 : vector<2x1x3xf32> to vector<2x3xf32>
    %80 = arith.addf %77, %79 : vector<2x3xf32>
    %cst_18 = arith.constant dense<0xFF800000> : vector<2xf32>
    %81 = vector.multi_reduction <maximumf>, %80, %cst_18 [1] : vector<2x3xf32> to vector<2xf32>
    %82 = vector.shape_cast %81 : vector<2xf32> to vector<2x1xf32>
    %83 = vector.broadcast %82 : vector<2x1xf32> to vector<2x3xf32>
    %84 = arith.subf %80, %83 : vector<2x3xf32>
    %85 = math.exp %84 : vector<2x3xf32>
    %cst_19 = arith.constant dense<0.000000e+00> : vector<2x3xf32>
    %86 = tpu.matmul %85, %22, %cst_19 {dimension_numbers = #tpu.dot_dimension_numbers<[1], [0], [0], [1], [0, 0, 1, 1], [], []>} : vector<2x3xf32>, vector<3x3xf32>, vector<2x3xf32> -> vector<2x3xf32>
    %87 = vector.broadcast %82 : vector<2x1xf32> to vector<2x3xf32>
    %88 = vector.broadcast %19 : vector<1x3xf32> to vector<2x3xf32>
    %89 = arith.addf %87, %88 : vector<2x3xf32>
    %90 = math.log %86 : vector<2x3xf32>
    %91 = arith.addf %89, %90 : vector<2x3xf32>
    %92 = vector.extract_strided_slice %0 {offsets = [0, 5, 0], sizes = [2, 1, 3], strides = [1, 1, 1]} : vector<2x8x3xf32> to vector<2x1x3xf32>
    %93 = vector.shape_cast %92 : vector<2x1x3xf32> to vector<2x3xf32>
    %94 = arith.addf %91, %93 : vector<2x3xf32>
    %cst_20 = arith.constant dense<0xFF800000> : vector<2xf32>
    %95 = vector.multi_reduction <maximumf>, %94, %cst_20 [1] : vector<2x3xf32> to vector<2xf32>
    %96 = vector.shape_cast %95 : vector<2xf32> to vector<2x1xf32>
    %97 = vector.broadcast %96 : vector<2x1xf32> to vector<2x3xf32>
    %98 = arith.subf %94, %97 : vector<2x3xf32>
    %99 = math.exp %98 : vector<2x3xf32>
    %cst_21 = arith.constant dense<0.000000e+00> : vector<2x3xf32>
    %100 = tpu.matmul %99, %22, %cst_21 {dimension_numbers = #tpu.dot_dimension_numbers<[1], [0], [0], [1], [0, 0, 1, 1], [], []>} : vector<2x3xf32>, vector<3x3xf32>, vector<2x3xf32> -> vector<2x3xf32>
    %101 = vector.broadcast %96 : vector<2x1xf32> to vector<2x3xf32>
    %102 = vector.broadcast %19 : vector<1x3xf32> to vector<2x3xf32>
    %103 = arith.addf %101, %102 : vector<2x3xf32>
    %104 = math.log %100 : vector<2x3xf32>
    %105 = arith.addf %103, %104 : vector<2x3xf32>
    %106 = vector.extract_strided_slice %0 {offsets = [0, 6, 0], sizes = [2, 1, 3], strides = [1, 1, 1]} : vector<2x8x3xf32> to vector<2x1x3xf32>
    %107 = vector.shape_cast %106 : vector<2x1x3xf32> to vector<2x3xf32>
    %108 = arith.addf %105, %107 : vector<2x3xf32>
    %cst_22 = arith.constant dense<0xFF800000> : vector<2xf32>
    %109 = vector.multi_reduction <maximumf>, %108, %cst_22 [1] : vector<2x3xf32> to vector<2xf32>
    %110 = vector.shape_cast %109 : vector<2xf32> to vector<2x1xf32>
    %111 = vector.broadcast %110 : vector<2x1xf32> to vector<2x3xf32>
    %112 = arith.subf %108, %111 : vector<2x3xf32>
    %113 = math.exp %112 : vector<2x3xf32>
    %cst_23 = arith.constant dense<0.000000e+00> : vector<2x3xf32>
    %114 = tpu.matmul %113, %22, %cst_23 {dimension_numbers = #tpu.dot_dimension_numbers<[1], [0], [0], [1], [0, 0, 1, 1], [], []>} : vector<2x3xf32>, vector<3x3xf32>, vector<2x3xf32> -> vector<2x3xf32>
    %115 = vector.broadcast %110 : vector<2x1xf32> to vector<2x3xf32>
    %116 = vector.broadcast %19 : vector<1x3xf32> to vector<2x3xf32>
    %117 = arith.addf %115, %116 : vector<2x3xf32>
    %118 = math.log %114 : vector<2x3xf32>
    %119 = arith.addf %117, %118 : vector<2x3xf32>
    %120 = vector.extract_strided_slice %0 {offsets = [0, 7, 0], sizes = [2, 1, 3], strides = [1, 1, 1]} : vector<2x8x3xf32> to vector<2x1x3xf32>
    %121 = vector.shape_cast %120 : vector<2x1x3xf32> to vector<2x3xf32>
    %122 = arith.addf %119, %121 : vector<2x3xf32>
    %cst_24 = arith.constant dense<0xFF800000> : vector<2xf32>
    %123 = vector.multi_reduction <maximumf>, %122, %cst_24 [1] : vector<2x3xf32> to vector<2xf32>
    %124 = vector.shape_cast %123 : vector<2xf32> to vector<2x1xf32>
    %125 = vector.broadcast %124 : vector<2x1xf32> to vector<2x3xf32>
    %126 = arith.subf %122, %125 : vector<2x3xf32>
    %127 = math.exp %126 : vector<2x3xf32>
    %cst_25 = arith.constant dense<0.000000e+00> : vector<2xf32>
    %128 = vector.multi_reduction <add>, %127, %cst_25 [1] : vector<2x3xf32> to vector<2xf32>
    %129 = vector.shape_cast %128 : vector<2xf32> to vector<2x1xf32>
    %130 = math.log %129 : vector<2x1xf32>
    %131 = arith.addf %124, %130 : vector<2x1xf32>
    %132 = vector.shape_cast %131 : vector<2x1xf32> to vector<1x2x1xf32>
    %cst_26 = arith.constant dense<0.000000e+00> : vector<1xf32>
    %133 = vector.multi_reduction <add>, %132, %cst_26 [1, 2] : vector<1x2x1xf32> to vector<1xf32>
    %134 = vector.shape_cast %133 : vector<1xf32> to vector<1x1x1xf32>
    %135 = vector.extract %134[0, 0, 0] : f32 from vector<1x1x1xf32>
    %136 = arith.addf %7, %17 : f32
    %137 = arith.subf %135, %136 : f32
    %cst_27 = arith.constant 0.000000e+00 : f32
    %138 = vector.broadcast %cst_27 : f32 to vector<1x1xf32>
    %139 = vector.broadcast %137 : f32 to vector<1x1xf32>
    %140 = arith.addf %139, %138 : vector<1x1xf32>
    %c0_28 = arith.constant 0 : index
    %c0_29 = arith.constant 0 : index
    %141 = vector.load %arg4[%c0_28, %c0_29] : memref<1x1xf32, #tpu.memory_space<vmem>>, vector<1x1xf32>
    tpu.vector_store %arg4[%c0_28, %c0_29], %140 {strides = array<i32>} : memref<1x1xf32, #tpu.memory_space<vmem>>, vector<1x1xf32>,
    return
  }
  func.func @transform_0(%arg0: i32) -> (i32, i32, i32) {
    %c0_i32 = arith.constant 0 : i32
    %c0_i32_0 = arith.constant 0 : i32
    %c0_i32_1 = arith.constant 0 : i32
    %c0_i32_2 = arith.constant 0 : i32
    return %c0_i32, %c0_i32_0, %c0_i32_1 : i32, i32, i32
  }
  func.func @transform_1(%arg0: i32) -> (i32, i32, i32) {
    %c0_i32 = arith.constant 0 : i32
    %c0_i32_0 = arith.constant 0 : i32
    %c0_i32_1 = arith.constant 0 : i32
    %c0_i32_2 = arith.constant 0 : i32
    return %c0_i32, %c0_i32_0, %c0_i32_1 : i32, i32, i32
  }
  func.func @transform_2(%arg0: i32) -> (i32, i32) {
    %c0_i32 = arith.constant 0 : i32
    %c0_i32_0 = arith.constant 0 : i32
    %c0_i32_1 = arith.constant 0 : i32
    return %c0_i32, %c0_i32_0 : i32, i32
  }
  func.func @transform_3(%arg0: i32) -> (i32, i32) {
    %c0_i32 = arith.constant 0 : i32
    %c0_i32_0 = arith.constant 0 : i32
    %c0_i32_1 = arith.constant 0 : i32
    return %c0_i32, %c0_i32_0 : i32, i32
  }
}

</mosaic_0001>

<bundles_post_ra>
// kernel: j_crf_forward.1
= control target key start
LH: loop header
LB: loop body
LE: loop exit
PB: predicated region body
PF: predicated region fallthrough
CT: control target
= control target key end

     0   :  { %vm153_vm0 = vcmask 1041409   ;;  %vm156_vm1 = vcmask 17408   ;;  %vm139_vm2 = vcmask 18432   ;;  %s1136_s0 = inlined_call_operand.vmem [shape: f32[2,8,3], index: 0, kind: input, shape index: {}]   ;;  %s1137_s1 = inlined_call_operand.vmem [shape: f32[2,8,3], index: 1, kind: input, shape index: {}]   ;;  %s1138_s2 = inlined_call_operand.vmem [shape: f32[3,3], index: 2, kind: input, shape index: {}]   ;;  %s1139_s3 = inlined_call_operand.hbm [shape: f32[1,1], index: 3, kind: output, shape index: {}]  }
   0x1   :  { %v997_v0 = vld [vmem:[%s1136_s0] sm:$0xff]  ;;  %v1002_v1 = vld [vmem:[%s1136_s0 + $0x8] sm:$0xff] }
   0x2   :  { %v19_v2 = vld [vmem:[%s1138_s2] sm:$0x7]  ;;  %v152_v3 = vrot.slane %v1002_v1, 7 }
   0x3   :  { %8 = vsyncpa [#allocation3], 0  ;;  %v140_v4 = vsel %vm139_vm2, %v19_v2, -inf  ;;  %v971_v15 = vmov 0.0   ;;  %vm41_vm3 = vcmask 1042432   ;;  %vm972_vm4 = vmmov 0  }
   0x4   :  { %v154_v5 = vsel %vm153_vm0, %v152_v3, %v997_v0  ;;  %v141_v6 = vrot.slane %v140_v4, 4  ;;  %867 = vmatprep.subr.mxu1 %v971_v15  ;;  %869 = vmatprep.mubr.msk.f32.mxu1 %vm972_vm4, %v971_v15  ;;  %vm22_vm5 = vcmask 23552   ;;  %v253_v29 = vrot.slane %v997_v0, 1  ;;  %v1042_v37 = vld [vmem:[%s1137_s1] sm:$0xff]  ;;  %v1047_v38 = vld [vmem:[%s1137_s1 + $0x8] sm:$0xff]  ;;  %s973_s22 = smov [#allocation2]  }
   0x5   :  { %v157_v7 = vsel %vm156_vm1, %v154_v5, -inf  ;;  %862 = vmatprep.subr.msk.mxu0 %vm41_vm3, %v19_v2  ;;  %864 = vmatprep.mubr.msk.f32.mxu0 %vm22_vm5, %v1042_v37  ;;  %v121_v44 = vrot.slane %v1047_v38, 1  ;;  %v120_v45 = vrot.slane %v1042_v37, 1  ;;  %vm126_vm6 = vcmask 22528   ;;  %s820_s23 = sshll.u32 %s973_s22, 4  ;;  %s821_s23 = int_to_ptr.vmem [resolvable:$true] %s820_s23 }
   0x6   :  { %158 = vmax.xlane.f32.xlu0 %v157_v7  ;;  %v142_v8 = vmax.f32 %v140_v4, %v141_v6  ;;  %863 = vmatpush3.msk.msra.mxu0 %vm41_vm3, %v19_v2  ;;  %v254_v33 = vsel %vm153_vm0, %v1002_v1, %v253_v29  ;;  %v340_v54 = vrot.slane %v997_v0, 2  ;;  %v341_v55 = vrot.slane %v1002_v1, 1  ;;  %s947_s26 = scalar_lea.vmem %s821_s23, 16  ;;  %s951_s27 = scalar_lea.vmem %s821_s23, 32 }
   0x7   :  { %872 = vmatprep.subr.mxu0 %v971_v15  ;;  %865 = vmatmul.mubr.msk.f32.vlgmr.msra.gmra.mrb[0].mxu0 %vm22_vm5, %v1047_v38  ;;  %v428_v7 = vrot.slane %v997_v0, 3  ;;  %vm797_vm7 = vcmask 1024   ;;  %vm812_vm8 = vcmask 0   ;;  %p948_p0 = scmp.ne.s32.totalorder %s821_s23, %s947_s26  ;;  %p952_p1 = scmp.lt.s32.totalorder %s821_s23, %s821_s23 }
   0x8   :  { %v143_v9 = vrot.slane %v142_v8, 2  ;;  %874 = vmatprep.mubr.msk.f32.mxu0 %vm972_vm4, %v971_v15  ;;  %v342_v59 = vsel %vm153_vm0, %v341_v55, %v340_v54  ;;  %p953_p2 = scmp.lt.s32.totalorder %s951_s27, %s947_s26 }
   0xa   :  { %v144_v10 = vmax.f32 %v142_v8, %v143_v9  ;;  %v429_v8 = vrot.slane %v1002_v1, 2  ;;  %p954_p3 = por %p953_p2, %p952_p1 }
   0xc   :  { %v145_v11 = vrot.slane %v144_v10, 1  ;;  %p955_p4 = pnand %p954_p3, %p948_p0 }
   0xe   :  { %v1011_v12 = vmax.f32 %v144_v10, %v145_v11 }
  0x10   :  { %v147_v13 = vsub.f32 %v19_v2, %v1011_v12 }
  0x12   :  { %v148_v14 = vmul.f32 1.442695, %v147_v13  ;;  %v430_v13 = vsel %vm153_vm0, %v429_v8, %v428_v7 }
  0x14   :  { %911 = vpow2.f32 %v148_v14 }
  0x1e   :  { %v1019_v16 = vpop.eup %911 }
  0x1f   :  { %868 = vmatpush3.msk.msra.mxu1 %vm41_vm3, %v1019_v16  ;;  %873 = vmatpush3.msk.msra.mxu0 %vm41_vm3, %v1019_v16 }
  0x20   :  { %877 = vmatprep.subr.mxu1 %v971_v15  ;;  %882 = vmatprep.subr.mxu0 %v971_v15 }
  0x93   :  { %v159_v17 = vpop.xlane.xlu0 %158 }
  0x94   :  { %v161_v18 = vrot.slane %v159_v17, 1  ;;  %v164_v19 = vsub.f32 %v997_v0, %v159_v17  ;;  %v249_v31 = vadd.f32 %v159_v17, %v1011_v12 }
  0x96   :  { %v165_v20 = vsub.f32 %v1002_v1, %v161_v18  ;;  %v166_v21 = vmul.f32 1.442695, %v164_v19 }
  0x98   :  { %v168_v22 = vmul.f32 1.442695, %v165_v20 }
  0x9a   :  { %913 = vpow2.f32 %v168_v22 }
  0x9b   :  { %915 = vpow2.f32 %v166_v21 }
  0xa4   :  { %v914_v23 = vpop.eup %913 }
  0xa5   :  { %v172_v24 = vrot.slane %v914_v23, 7  ;;  %v916_v25 = vpop.eup %915 }
  0xa7   :  { %v173_v26 = vsel %vm153_vm0, %v172_v24, %v916_v25  ;;  %v516_v25 = vrot.slane %v997_v0, 4 }
  0xa8   :  { %870 = vmatmul.mubr.msk.f32.vlgmr.msra.gmra.mrb[0].mxu1 %vm22_vm5, %v173_v26  ;;  %v517_v26 = vrot.slane %v1002_v1, 3 }
  0xa9   :  { %878 = vmatpush3.msk.msra.mxu1 %vm41_vm3, %v1019_v16  ;;  %879 = vmatprep.mubr.msk.f32.mxu1 %vm972_vm4, %v971_v15 }
  0xaa   :  { %887 = vmatprep.subr.mxu1 %v971_v15 }
  0xda   :  { %v866_v43 = vpop.f32.mrb[0].mxu0 }
  0xdb   :  { %v111_v46 = vpop.f32.mrb[1].mxu0  ;;  %v125_v47 = vmul.f32 %v866_v43, %v121_v44  ;;  %v605_v43 = vrot.slane %v1002_v1, 4 }
  0xdc   :  { %v124_v48 = vmul.f32 %v120_v45, %v111_v46 }
  0xdd   :  { %v128_v50 = vsel %vm126_vm6, %v125_v47, 0.0 }
  0xde   :  { %v127_v49 = vsel %vm126_vm6, %v124_v48, 0.0 }
  0xdf   :  { %v1066_v51 = vadd.f32 %v128_v50, %v127_v49 }
 0x17b   :  { %v245_v27 = vpop.f32.mrb[0].mxu1 }
 0x17c   :  { %917 = vlog2.f32 %v245_v27  ;;  %v871_v28 = vpop.f32.mrb[1].mxu1 }
 0x186   :  { %v918_v30 = vpop.eup %917 }
 0x187   :  { %v251_v32 = vmul.f32 0.6931472, %v918_v30  ;;  %v518_v30 = vsel %vm153_vm0, %v517_v26, %v516_v25 }
 0x189   :  { %v252_v34 = vadd.f32 %v251_v32, %v249_v31 }
 0x18b   :  { %v256_v35 = vadd.f32 %v254_v33, %v252_v34 }
 0x18d   :  { %v257_v36 = vsel %vm156_vm1, %v256_v35, -inf }
 0x18e   :  { %258 = vmax.xlane.f32.xlu0 %v257_v36 }
 0x21b   :  { %v259_v39 = vpop.xlane.xlu0 %258 }
 0x21c   :  { %v260_v40 = vsub.f32 %v256_v35, %v259_v39  ;;  %v336_v57 = vadd.f32 %v259_v39, %v1011_v12 }
 0x21e   :  { %v261_v41 = vmul.f32 1.442695, %v260_v40 }
 0x220   :  { %919 = vpow2.f32 %v261_v41 }
 0x22a   :  { %v920_v42 = vpop.eup %919 }
 0x22b   :  { %875 = vmatmul.mubr.msk.f32.vlgmr.msra.gmra.mrb[2].mxu0 %vm22_vm5, %v920_v42  ;;  %v604_v42 = vrot.slane %v997_v0, 5 }
 0x22c   :  { %883 = vmatpush3.msk.msra.mxu0 %vm41_vm3, %v1019_v16  ;;  %884 = vmatprep.mubr.msk.f32.mxu0 %vm972_vm4, %v971_v15 }
 0x22d   :  { %892 = vmatprep.subr.mxu0 %v971_v15  ;;  %v606_v47 = vsel %vm153_vm0, %v605_v43, %v604_v42 }
 0x2fe   :  { %v332_v52 = vpop.f32.mrb[2].mxu0 }
 0x2ff   :  { %921 = vlog2.f32 %v332_v52  ;;  %v876_v53 = vpop.f32.mrb[3].mxu0 }
 0x309   :  { %v922_v56 = vpop.eup %921 }
 0x30a   :  { %v338_v58 = vmul.f32 0.6931472, %v922_v56  ;;  %v692_v56 = vrot.slane %v997_v0, 6 }
 0x30c   :  { %v339_v60 = vadd.f32 %v338_v58, %v336_v57  ;;  %v693_v57 = vrot.slane %v1002_v1, 5 }
 0x30e   :  { %v344_v61 = vadd.f32 %v342_v59, %v339_v60 }
 0x310   :  { %v345_v62 = vsel %vm156_vm1, %v344_v61, -inf }
 0x311   :  { %346 = vmax.xlane.f32.xlu1 %v345_v62 }
 0x39e   :  { %v347_v63 = vpop.xlane.xlu1 %346 }
 0x39f   :  { %v348_v2 = vsub.f32 %v344_v61, %v347_v63  ;;  %v424_v10 = vadd.f32 %v347_v63, %v1011_v12  ;;  %v694_v61 = vsel %vm153_vm0, %v693_v57, %v692_v56 }
 0x3a1   :  { %v349_v3 = vmul.f32 1.442695, %v348_v2 }
 0x3a3   :  { %923 = vpow2.f32 %v349_v3 }
 0x3ad   :  { %v924_v4 = vpop.eup %923 }
 0x3ae   :  { %880 = vmatmul.mubr.msk.f32.vlgmr.msra.gmra.mrb[2].mxu1 %vm22_vm5, %v924_v4 }
 0x3af   :  { %888 = vmatpush3.msk.msra.mxu1 %vm41_vm3, %v1019_v16  ;;  %889 = vmatprep.mubr.msk.f32.mxu1 %vm972_vm4, %v971_v15 }
 0x3b0   :  { %897 = vmatprep.subr.mxu1 %v971_v15 }
 0x481   :  { %v420_v5 = vpop.f32.mrb[2].mxu1 }
 0x482   :  { %925 = vlog2.f32 %v420_v5  ;;  %v881_v6 = vpop.f32.mrb[3].mxu1 }
 0x48c   :  { %v926_v9 = vpop.eup %925 }
 0x48d   :  { %v426_v11 = vmul.f32 0.6931472, %v926_v9  ;;  %v780_v9 = vrot.slane %v997_v0, 7 }
 0x48f   :  { %v427_v14 = vadd.f32 %v426_v11, %v424_v10  ;;  %v781_v10 = vrot.slane %v1002_v1, 6 }
 0x491   :  { %v432_v17 = vadd.f32 %v430_v13, %v427_v14 }
 0x493   :  { %v433_v18 = vsel %vm156_vm1, %v432_v17, -inf }
 0x494   :  { %434 = vmax.xlane.f32.xlu1 %v433_v18 }
 0x521   :  { %v435_v19 = vpop.xlane.xlu1 %434 }
 0x522   :  { %v436_v20 = vsub.f32 %v432_v17, %v435_v19  ;;  %v512_v28 = vadd.f32 %v435_v19, %v1011_v12  ;;  %v782_v17 = vsel %vm153_vm0, %v781_v10, %v780_v9 }
 0x524   :  { %v437_v21 = vmul.f32 1.442695, %v436_v20 }
 0x526   :  { %927 = vpow2.f32 %v437_v21  ;;  %v20_v21 = vmul.f32 %v1042_v37, %v997_v0 }
 0x530   :  { %v928_v22 = vpop.eup %927 }
 0x531   :  { %885 = vmatmul.mubr.msk.f32.vlgmr.msra.gmra.mrb[4].mxu0 %vm22_vm5, %v928_v22  ;;  %v21_v22 = vmul.f32 %v1047_v38, %v1002_v1 }
 0x532   :  { %893 = vmatpush3.msk.msra.mxu0 %vm41_vm3, %v1019_v16  ;;  %894 = vmatprep.mubr.msk.f32.mxu0 %vm972_vm4, %v971_v15 }
 0x604   :  { %v508_v23 = vpop.f32.mrb[4].mxu0 }
 0x605   :  { %929 = vlog2.f32 %v508_v23  ;;  %v886_v24 = vpop.f32.mrb[5].mxu0  ;;  %v23_v23 = vsel %vm22_vm5, %v20_v21, 0.0 }
 0x606   :  { %v24_v24 = vsel %vm22_vm5, %v21_v22, 0.0 }
 0x607   :  { %v25_v25 = vadd.f32 %v24_v24, %v23_v23 }
 0x60f   :  { %v930_v27 = vpop.eup %929 }
 0x610   :  { %v514_v29 = vmul.f32 0.6931472, %v930_v27 }
 0x612   :  { %v515_v31 = vadd.f32 %v514_v29, %v512_v28 }
 0x614   :  { %v520_v32 = vadd.f32 %v518_v30, %v515_v31 }
 0x616   :  { %v521_v33 = vsel %vm156_vm1, %v520_v32, -inf }
 0x617   :  { %522 = vmax.xlane.f32.xlu0 %v521_v33 }
 0x6a4   :  { %v523_v34 = vpop.xlane.xlu0 %522 }
 0x6a5   :  { %v524_v35 = vsub.f32 %v520_v32, %v523_v34  ;;  %v600_v45 = vadd.f32 %v523_v34, %v1011_v12 }
 0x6a7   :  { %v525_v36 = vmul.f32 1.442695, %v524_v35 }
 0x6a9   :  { %931 = vpow2.f32 %v525_v36 }
 0x6b3   :  { %v932_v39 = vpop.eup %931 }
 0x6b4   :  { %890 = vmatmul.mubr.msk.f32.vlgmr.msra.gmra.mrb[4].mxu1 %vm22_vm5, %v932_v39 }
 0x6b5   :  { %898 = vmatpush3.msk.msra.mxu1 %vm41_vm3, %v1019_v16  ;;  %899 = vmatprep.mubr.msk.f32.mxu1 %vm972_vm4, %v971_v15 }
 0x787   :  { %v596_v40 = vpop.f32.mrb[4].mxu1 }
 0x788   :  { %933 = vlog2.f32 %v596_v40  ;;  %v891_v41 = vpop.f32.mrb[5].mxu1 }
 0x792   :  { %v934_v44 = vpop.eup %933 }
 0x793   :  { %v602_v46 = vmul.f32 0.6931472, %v934_v44 }
 0x795   :  { %v603_v48 = vadd.f32 %v602_v46, %v600_v45 }
 0x797   :  { %v608_v49 = vadd.f32 %v606_v47, %v603_v48 }
 0x799   :  { %v609_v16 = vsel %vm156_vm1, %v608_v49, -inf }
 0x79a   :  { %610 = vmax.xlane.f32.xlu1 %v609_v16 }
 0x827   :  { %v611_v50 = vpop.xlane.xlu1 %610 }
 0x828   :  { %v612_v15 = vsub.f32 %v608_v49, %v611_v50  ;;  %v688_v59 = vadd.f32 %v611_v50, %v1011_v12 }
 0x82a   :  { %v613_v52 = vmul.f32 1.442695, %v612_v15 }
 0x82c   :  { %935 = vpow2.f32 %v613_v52 }
 0x836   :  { %v936_v53 = vpop.eup %935 }
 0x837   :  { %895 = vmatmul.mubr.msk.f32.vlgmr.msra.gmra.mrb[6].mxu0 %vm22_vm5, %v936_v53 }
 0x90a   :  { %v684_v54 = vpop.f32.mrb[6].mxu0 }
 0x90b   :  { %937 = vlog2.f32 %v684_v54  ;;  %v896_v55 = vpop.f32.mrb[7].mxu0 }
 0x915   :  { %v938_v58 = vpop.eup %937 }
 0x916   :  { %v690_v60 = vmul.f32 0.6931472, %v938_v58 }
 0x918   :  { %v691_v62 = vadd.f32 %v690_v60, %v688_v59 }
 0x91a   :  { %v696_v63 = vadd.f32 %v694_v61, %v691_v62 }
 0x91c   :  { %v697_v2 = vsel %vm156_vm1, %v696_v63, -inf }
 0x91d   :  { %698 = vmax.xlane.f32.xlu0 %v697_v2 }
 0x9aa   :  { %v699_v3 = vpop.xlane.xlu0 %698 }
 0x9ab   :  { %v700_v4 = vsub.f32 %v696_v63, %v699_v3  ;;  %v776_v13 = vadd.f32 %v699_v3, %v1011_v12 }
 0x9ad   :  { %v701_v5 = vmul.f32 1.442695, %v700_v4 }
 0x9af   :  { %939 = vpow2.f32 %v701_v5 }
 0x9b9   :  { %v940_v6 = vpop.eup %939 }
 0x9ba   :  { %900 = vmatmul.mubr.msk.f32.vlgmr.msra.gmra.mrb[6].mxu1 %vm22_vm5, %v940_v6 }
 0xa8d   :  { %v772_v7 = vpop.f32.mrb[6].mxu1 }
 0xa8e   :  { %941 = vlog2.f32 %v772_v7  ;;  %v901_v8 = vpop.f32.mrb[7].mxu1 }
 0xa98   :  { %v942_v11 = vpop.eup %941 }
 0xa99   :  { %v778_v14 = vmul.f32 0.6931472, %v942_v11 }
 0xa9b   :  { %v779_v18 = vadd.f32 %v778_v14, %v776_v13 }
 0xa9d   :  { %v784_v19 = vadd.f32 %v782_v17, %v779_v18 }
 0xa9f   :  { %v785_v20 = vsel %vm156_vm1, %v784_v19, -inf }
 0xaa0   :  { %786 = vmax.xlane.f32.xlu1 %v785_v20 }
 0xaa4   :  { %26 = vadd.xlane.f32.xlu1 %v25_v25 }
 0xb2d   :  { %v787_v12 = vpop.xlane.xlu1 %786 }
 0xb2e   :  { %v788_v26 = vsub.f32 %v784_v19, %v787_v12 }
 0xb30   :  { %v789_v27 = vmul.f32 1.442695, %v788_v26 }
 0xb31   :  { %v27_v0 = vpop.xlane.xlu1 %26 }
 0xb32   :  { %943 = vpow2.f32 %v789_v27  ;;  %v28_v37 = vrot.slane %v27_v0, 4 }
 0xb34   :  { %v29_v30 = vadd.f32 %v28_v37, %v27_v0 }
 0xb36   :  { %v30_v1 = vrot.slane %v29_v30, 2 }
 0xb38   :  { %v31_v38 = vadd.f32 %v30_v1, %v29_v30 }
 0xb3a   :  { %v32_v31 = vrot.slane %v31_v38, 1 }
 0xb3c   :  { %v944_v28 = vpop.eup %943  ;;  %v33_v32 = vadd.f32 %v32_v31, %v31_v38 }
 0xb3d   :  { %v791_v29 = vsel %vm156_vm1, %v944_v28, 0.0 }
 0xb3e   :  { %792 = vadd.xlane.f32.xlu0 %v791_v29  ;;  %902 = vpush %v33_v32 }
 0xb42   :  { %130 = vadd.xlane.f32.xlu0 %v1066_v51 }
 0xb6f   :  { %s903_s1 = spop %902 }
 0xbcb   :  { %v793_v33 = vpop.xlane.xlu0 %792 }
 0xbcc   :  { %945 = vlog2.f32 %v793_v33 }
 0xbcf   :  { %v131_v34 = vpop.xlane.xlu0 %130 }
 0xbd0   :  { %v132_v35 = vrot.slane %v131_v34, 4 }
 0xbd2   :  { %v133_v36 = vadd.f32 %v132_v35, %v131_v34 }
 0xbd4   :  { %v134_v39 = vrot.slane %v133_v36, 2 }
 0xbd6   :  { %v946_v40 = vpop.eup %945  ;;  %v135_v41 = vadd.f32 %v134_v39, %v133_v36 }
 0xbd7   :  { %v795_v42 = vmul.f32 0.6931472, %v946_v40 }
 0xbd8   :  { %v136_v43 = vrot.slane %v135_v41, 1 }
 0xbd9   :  { %v796_v51 = vadd.f32 %v795_v42, %v787_v12 }
 0xbda   :  { %v137_v44 = vadd.f32 %v136_v43, %v135_v41 }
 0xbdb   :  { %v798_v45 = vsel %vm797_vm7, %v796_v51, 0.0 }
 0xbdc   :  { %799 = vadd.xlane.f32.xlu1 %v798_v45  ;;  %904 = vpush %v137_v44 }
 0xc0d   :  { %s905_s20 = spop %904 }
 0xc0e   :  { %s808_s21 = sadd.f32 %s905_s20, %s903_s1 }
 0xc69   :  { %v800_v46 = vpop.xlane.xlu1 %799 }
 0xc6a   :  { %v801_v47 = vrot.slane %v800_v46, 4 }
 0xc6c   :  { %v802_v48 = vadd.f32 %v801_v47, %v800_v46 }
 0xc6e   :  { %v803_v49 = vrot.slane %v802_v48, 2 }
 0xc70   :  { %v804_v16 = vadd.f32 %v803_v49, %v802_v48 }
 0xc72   :  { %v805_v50 = vrot.slane %v804_v16, 1 }
 0xc74   :  { %v806_v15 = vadd.f32 %v805_v50, %v804_v16 }
 0xc76   :  { %906 = vpush %v806_v15 }
 0xca7   :  { %s907_s24 = spop %906 }
 0xca8   :  { %s809_s25 = ssub.f32 %s907_s24, %s808_s21 }
 0xcaa   :  { %v810_v52 = vstv %s809_s25 }
 0xcab   :  { %813 = vst.msk [vmem:[#allocation2] sm:$0x1] %vm812_vm8, %v810_v52 }
 0xcac   :  { %958 = shalt.err (!%p955_p4)
}
 0xcad   :  { %s959_s30 = scalar_lea.hbm %s1139_s3, 16 }
 0xcae   :  { %p960_p5 = scmp.ne.s32.totalorder %s1139_s3, %s959_s30  ;;  %p963_p6 = scmp.lt.u32.totalorder %s959_s30, %s1139_s3 }
 0xcb0   :  { %p965_p7 = pnand %p963_p6, %p960_p5 }
 0xcb2   :  { %968 = shalt.err (!%p965_p7)
}
 0xcb3   :  { %823 = dma.vmem_to_hbm [thread:$0]  %s821_s23, 16, %s1139_s3, [#allocation3]  }
 0xcb4   :  { %969 = dma.done.wait [#allocation3], 16  }
 0xcb5   :  { %970 = vsyncadd [#allocation3], 4294967280 }
 0xcb6   :  { %827 = vsyncpa [#allocation3], 1 }

</bundles_post_ra>
